<compile_context>
chip_gen: v7x
topology: tpu7x:2x2x1
jax: 0.10.0
libtpu: 0.0.40
codegen_flags: <defaults>
</compile_context>

<pallas_src>
import jax
import jax.numpy as jnp
from jax.experimental import pallas as pl
from jax.experimental.pallas import tpu as pltpu

H1, H2, H3, N_OUT = 128, 128, 64, 3
SUBLANE = 8
TB_MAX = 1024  # target rows per batch tile (review: ~1-2K rows reaches HBM roofline)


def _round_up(n, m):
    return ((n + m - 1) // m) * m


def mlp_kernel(x_ref, w1_ref, b1_ref, w2_ref, b2_ref,
               w3_ref, b3_ref, w4_ref, b4_ref, o_ref):
    # Full f32 path: layer1..layer3 + ReLU (dropout = identity in eval), output layer.
    x = x_ref[...]
    h = jnp.maximum(
        jnp.dot(x, w1_ref[...], preferred_element_type=jnp.float32) + b1_ref[...], 0.0)
    h = jnp.maximum(
        jnp.dot(h, w2_ref[...], preferred_element_type=jnp.float32) + b2_ref[...], 0.0)
    h = jnp.maximum(
        jnp.dot(h, w3_ref[...], preferred_element_type=jnp.float32) + b3_ref[...], 0.0)
    out = jnp.dot(h, w4_ref[...], preferred_element_type=jnp.float32) + b4_ref[...]
    o_ref[...] = out.astype(o_ref.dtype)


def _choose_tiling(batch):
    """Pick (tile_rows, padded_batch): large tiles, bounded pad waste, >=2 tiles
    for big batches (so the second v7x TensorCore is not idle)."""
    b_min = _round_up(max(batch, 1), SUBLANE)
    if b_min <= TB_MAX:
        return b_min, b_min                      # single small tile, minimal pad
    n_tiles = max(2, pl.cdiv(b_min, TB_MAX))
    tb = _round_up(pl.cdiv(b_min, n_tiles), SUBLANE)
    return tb, tb * n_tiles


@jax.jit
def neural_net_forward(x, params):
    """x: (B, d_in) float32. params: dict of (in, out) weights + (1, out) biases.

    Returns (B, 3) float32 logits, matching PyTorch NeuralNet.forward (eval mode).
    """
    B, d_in = x.shape
    w1, b1 = params["w1"], params["b1"]
    w2, b2 = params["w2"], params["b2"]
    w3, b3 = params["w3"], params["b3"]
    w4, b4 = params["w4"], params["b4"]

    tb, b_pad = _choose_tiling(B)
    if b_pad != B:
        x = jnp.pad(x, ((0, b_pad - B), (0, 0)))
    grid = (b_pad // tb,)

    # Weights/biases stay VMEM-resident across the whole grid (constant index_map);
    # only x and the narrow output stream HBM<->VMEM.
    resident = lambda shp: pl.BlockSpec(shp, lambda i: (0, 0))

    out = pl.pallas_call(
        mlp_kernel,
        out_shape=jax.ShapeDtypeStruct((b_pad, N_OUT), jnp.float32),
        grid=grid,
        in_specs=[
            pl.BlockSpec((tb, d_in), lambda i: (i, 0)),   # x: streamed per batch tile
            resident(w1.shape), resident(b1.shape),
            resident(w2.shape), resident(b2.shape),
            resident(w3.shape), resident(b3.shape),
            resident(w4.shape), resident(b4.shape),
        ],
        out_specs=pl.BlockSpec((tb, N_OUT), lambda i: (i, 0)),
        compiler_params=pltpu.CompilerParams(
            dimension_semantics=("parallel",)),
    )(x, w1, b1, w2, b2, w3, b3, w4, b4)

    return out[:B] if b_pad != B else out


def init_params(key, d_in):
    """Deterministic init matching nn.Linear shapes (stored transposed: (in, out))."""
    dims = [(d_in, H1), (H1, H2), (H2, H3), (H3, N_OUT)]
    params = {}
    for i, (fan_in, fan_out) in enumerate(dims, start=1):
        key, kw, kb = jax.random.split(key, 3)
        bound = 1.0 / jnp.sqrt(fan_in)
        params[f"w{i}"] = jax.random.uniform(
            kw, (fan_in, fan_out), jnp.float32, minval=-bound, maxval=bound)
        # biases kept 2D (1, out) for clean lane-broadcast inside the kernel
        params[f"b{i}"] = jax.random.uniform(
            kb, (1, fan_out), jnp.float32, minval=-bound, maxval=bound)
    return params


def reference_forward_f32(x, params):
    """Pure-JAX f32 reference (mirrors the PyTorch eval-mode forward)."""
    h = jnp.maximum(x @ params["w1"] + params["b1"], 0.0)
    h = jnp.maximum(h @ params["w2"] + params["b2"], 0.0)
    h = jnp.maximum(h @ params["w3"] + params["b3"], 0.0)
    return h @ params["w4"] + params["b4"]


if __name__ == "__main__":
    key = jax.random.PRNGKey(0)
    B, D_IN = 8, 32  # X_train.shape[1] is data-dependent; use 32 features here.

    key, kx, kp = jax.random.split(key, 3)
    x = jax.random.normal(kx, (B, D_IN), dtype=jnp.float32)
    params = init_params(kp, D_IN)

    out = neural_net_forward(x, params)
    out = jax.block_until_ready(out)
    assert out.shape == (B, N_OUT), out.shape

    ref = reference_forward_f32(x, params)
    assert jnp.allclose(out, ref, atol=1e-2, rtol=1e-2), \
        "mismatch vs f32 JAX reference"

    print("KERNEL_OK")
</pallas_src>

<mosaic_0001>
module attributes {stable_mosaic.version = 11 : i64} {
  func.func @mlp_kernel(%arg0: i32, %arg1: memref<8x32xf32, #tpu.memory_space<vmem>>, %arg2: memref<32x128xf32, #tpu.memory_space<vmem>>, %arg3: memref<1x128xf32, #tpu.memory_space<vmem>>, %arg4: memref<128x128xf32, #tpu.memory_space<vmem>>, %arg5: memref<1x128xf32, #tpu.memory_space<vmem>>, %arg6: memref<128x64xf32, #tpu.memory_space<vmem>>, %arg7: memref<1x64xf32, #tpu.memory_space<vmem>>, %arg8: memref<64x3xf32, #tpu.memory_space<vmem>>, %arg9: memref<1x3xf32, #tpu.memory_space<vmem>>, %arg10: memref<8x3xf32, #tpu.memory_space<vmem>>) attributes {dimension_semantics = [#tpu.dimension_semantics<parallel>], iteration_bounds = array<i64: 1>, scalar_prefetch = 0 : i64, scratch_operands = 0 : i64, tpu.core_type = #tpu.core_type<tc>, window_params = [{transform_indices = @transform_0, window_bounds = array<i64: 8, 32>}, {pipeline_mode = #tpu.pipeline_mode<synchronous>, transform_indices = @transform_1, window_bounds = array<i64: 32, 128>}, {pipeline_mode = #tpu.pipeline_mode<synchronous>, transform_indices = @transform_2, window_bounds = array<i64: 1, 128>}, {pipeline_mode = #tpu.pipeline_mode<synchronous>, transform_indices = @transform_3, window_bounds = array<i64: 128, 128>}, {pipeline_mode = #tpu.pipeline_mode<synchronous>, transform_indices = @transform_4, window_bounds = array<i64: 1, 128>}, {pipeline_mode = #tpu.pipeline_mode<synchronous>, transform_indices = @transform_5, window_bounds = array<i64: 128, 64>}, {pipeline_mode = #tpu.pipeline_mode<synchronous>, transform_indices = @transform_6, window_bounds = array<i64: 1, 64>}, {pipeline_mode = #tpu.pipeline_mode<synchronous>, transform_indices = @transform_7, window_bounds = array<i64: 64, 3>}, {pipeline_mode = #tpu.pipeline_mode<synchronous>, transform_indices = @transform_8, window_bounds = array<i64: 1, 3>}, {transform_indices = @transform_9, window_bounds = array<i64: 8, 3>}]} {
    %c0 = arith.constant 0 : index
    %c0_0 = arith.constant 0 : index
    %0 = vector.load %arg1[%c0, %c0_0] : memref<8x32xf32, #tpu.memory_space<vmem>>, vector<8x32xf32>
    %c0_1 = arith.constant 0 : index
    %c0_2 = arith.constant 0 : index
    %1 = vector.load %arg2[%c0_1, %c0_2] : memref<32x128xf32, #tpu.memory_space<vmem>>, vector<32x128xf32>
    %cst = arith.constant dense<0.000000e+00> : vector<8x128xf32>
    %2 = tpu.matmul %0, %1, %cst {dimension_numbers = #tpu.dot_dimension_numbers<[1], [0], [0], [1], [0, 0, 1, 1], [], []>} : vector<8x32xf32>, vector<32x128xf32>, vector<8x128xf32> -> vector<8x128xf32>
    %c0_3 = arith.constant 0 : index
    %c0_4 = arith.constant 0 : index
    %3 = vector.load %arg3[%c0_3, %c0_4] : memref<1x128xf32, #tpu.memory_space<vmem>>, vector<1x128xf32>
    %4 = vector.broadcast %3 : vector<1x128xf32> to vector<8x128xf32>
    %5 = arith.addf %2, %4 : vector<8x128xf32>
    %cst_5 = arith.constant 0.000000e+00 : f32
    %6 = vector.broadcast %cst_5 : f32 to vector<8x128xf32>
    %7 = arith.maximumf %5, %6 : vector<8x128xf32>
    %c0_6 = arith.constant 0 : index
    %c0_7 = arith.constant 0 : index
    %8 = vector.load %arg4[%c0_6, %c0_7] : memref<128x128xf32, #tpu.memory_space<vmem>>, vector<128x128xf32>
    %cst_8 = arith.constant dense<0.000000e+00> : vector<8x128xf32>
    %9 = tpu.matmul %7, %8, %cst_8 {dimension_numbers = #tpu.dot_dimension_numbers<[1], [0], [0], [1], [0, 0, 1, 1], [], []>} : vector<8x128xf32>, vector<128x128xf32>, vector<8x128xf32> -> vector<8x128xf32>
    %c0_9 = arith.constant 0 : index
    %c0_10 = arith.constant 0 : index
    %10 = vector.load %arg5[%c0_9, %c0_10] : memref<1x128xf32, #tpu.memory_space<vmem>>, vector<1x128xf32>
    %11 = vector.broadcast %10 : vector<1x128xf32> to vector<8x128xf32>
    %12 = arith.addf %9, %11 : vector<8x128xf32>
    %cst_11 = arith.constant 0.000000e+00 : f32
    %13 = vector.broadcast %cst_11 : f32 to vector<8x128xf32>
    %14 = arith.maximumf %12, %13 : vector<8x128xf32>
    %c0_12 = arith.constant 0 : index
    %c0_13 = arith.constant 0 : index
    %15 = vector.load %arg6[%c0_12, %c0_13] : memref<128x64xf32, #tpu.memory_space<vmem>>, vector<128x64xf32>
    %cst_14 = arith.constant dense<0.000000e+00> : vector<8x64xf32>
    %16 = tpu.matmul %14, %15, %cst_14 {dimension_numbers = #tpu.dot_dimension_numbers<[1], [0], [0], [1], [0, 0, 1, 1], [], []>} : vector<8x128xf32>, vector<128x64xf32>, vector<8x64xf32> -> vector<8x64xf32>
    %c0_15 = arith.constant 0 : index
    %c0_16 = arith.constant 0 : index
    %17 = vector.load %arg7[%c0_15, %c0_16] : memref<1x64xf32, #tpu.memory_space<vmem>>, vector<1x64xf32>
    %18 = vector.broadcast %17 : vector<1x64xf32> to vector<8x64xf32>
    %19 = arith.addf %16, %18 : vector<8x64xf32>
    %cst_17 = arith.constant 0.000000e+00 : f32
    %20 = vector.broadcast %cst_17 : f32 to vector<8x64xf32>
    %21 = arith.maximumf %19, %20 : vector<8x64xf32>
    %c0_18 = arith.constant 0 : index
    %c0_19 = arith.constant 0 : index
    %22 = vector.load %arg8[%c0_18, %c0_19] : memref<64x3xf32, #tpu.memory_space<vmem>>, vector<64x3xf32>
    %cst_20 = arith.constant dense<0.000000e+00> : vector<8x3xf32>
    %23 = tpu.matmul %21, %22, %cst_20 {dimension_numbers = #tpu.dot_dimension_numbers<[1], [0], [0], [1], [0, 0, 1, 1], [], []>} : vector<8x64xf32>, vector<64x3xf32>, vector<8x3xf32> -> vector<8x3xf32>
    %c0_21 = arith.constant 0 : index
    %c0_22 = arith.constant 0 : index
    %24 = vector.load %arg9[%c0_21, %c0_22] : memref<1x3xf32, #tpu.memory_space<vmem>>, vector<1x3xf32>
    %25 = vector.broadcast %24 : vector<1x3xf32> to vector<8x3xf32>
    %26 = arith.addf %23, %25 : vector<8x3xf32>
    %c0_23 = arith.constant 0 : index
    %c0_24 = arith.constant 0 : index
    %27 = vector.load %arg10[%c0_23, %c0_24] : memref<8x3xf32, #tpu.memory_space<vmem>>, vector<8x3xf32>
    tpu.vector_store %arg10[%c0_23, %c0_24], %26 {strides = array<i32>} : memref<8x3xf32, #tpu.memory_space<vmem>>, vector<8x3xf32>,
    return
  }
  func.func @transform_0(%arg0: i32) -> (i32, i32) {
    %c0_i32 = arith.constant 0 : i32
    %c0_i32_0 = arith.constant 0 : i32
    return %arg0, %c0_i32 : i32, i32
  }
  func.func @transform_1(%arg0: i32) -> (i32, i32) {
    %c0_i32 = arith.constant 0 : i32
    %c0_i32_0 = arith.constant 0 : i32
    %c0_i32_1 = arith.constant 0 : i32
    return %c0_i32, %c0_i32_0 : i32, i32
  }
  func.func @transform_2(%arg0: i32) -> (i32, i32) {
    %c0_i32 = arith.constant 0 : i32
    %c0_i32_0 = arith.constant 0 : i32
    %c0_i32_1 = arith.constant 0 : i32
    return %c0_i32, %c0_i32_0 : i32, i32
  }
  func.func @transform_3(%arg0: i32) -> (i32, i32) {
    %c0_i32 = arith.constant 0 : i32
    %c0_i32_0 = arith.constant 0 : i32
    %c0_i32_1 = arith.constant 0 : i32
    return %c0_i32, %c0_i32_0 : i32, i32
  }
  func.func @transform_4(%arg0: i32) -> (i32, i32) {
    %c0_i32 = arith.constant 0 : i32
    %c0_i32_0 = arith.constant 0 : i32
    %c0_i32_1 = arith.constant 0 : i32
    return %c0_i32, %c0_i32_0 : i32, i32
  }
  func.func @transform_5(%arg0: i32) -> (i32, i32) {
    %c0_i32 = arith.constant 0 : i32
    %c0_i32_0 = arith.constant 0 : i32
    %c0_i32_1 = arith.constant 0 : i32
    return %c0_i32, %c0_i32_0 : i32, i32
  }
  func.func @transform_6(%arg0: i32) -> (i32, i32) {
    %c0_i32 = arith.constant 0 : i32
    %c0_i32_0 = arith.constant 0 : i32
    %c0_i32_1 = arith.constant 0 : i32
    return %c0_i32, %c0_i32_0 : i32, i32
  }
  func.func @transform_7(%arg0: i32) -> (i32, i32) {
    %c0_i32 = arith.constant 0 : i32
    %c0_i32_0 = arith.constant 0 : i32
    %c0_i32_1 = arith.constant 0 : i32
    return %c0_i32, %c0_i32_0 : i32, i32
  }
  func.func @transform_8(%arg0: i32) -> (i32, i32) {
    %c0_i32 = arith.constant 0 : i32
    %c0_i32_0 = arith.constant 0 : i32
    %c0_i32_1 = arith.constant 0 : i32
    return %c0_i32, %c0_i32_0 : i32, i32
  }
  func.func @transform_9(%arg0: i32) -> (i32, i32) {
    %c0_i32 = arith.constant 0 : i32
    %c0_i32_0 = arith.constant 0 : i32
    return %arg0, %c0_i32 : i32, i32
  }
}

</mosaic_0001>

<bundles_post_ra>
// kernel: neural_net_forward.1
= control target key start
LH: loop header
LB: loop body
LE: loop exit
PB: predicated region body
PF: predicated region fallthrough
CT: control target
= control target key end

     0   :  { %v625_v0 = vmov 0.0|0.0   ;;  %vm626_vm0 = vmmov 0   ;;  %v627_v4 = vmov 0.0   ;;  %vm44_vm1 = vcmask 261120   ;;  %s858_s1 = inlined_call_operand.vmem [shape: f32[32,128], index: 1, kind: input, shape index: {}]   ;;  %s859_s3 = inlined_call_operand.vmem [shape: f32[128,128], index: 3, kind: input, shape index: {}]   ;;  %s860_s0 = inlined_call_operand.vmem [shape: f32[8,32], index: 0, kind: input, shape index: {}]   ;;  %s861_s5 = inlined_call_operand.vmem [shape: f32[128,64], index: 5, kind: input, shape index: {}]   ;;  %s862_s2 = inlined_call_operand.vmem [shape: f32[1,128], index: 2, kind: input, shape index: {}]   ;;  %s863_s7 = inlined_call_operand.vmem [shape: f32[64,3], index: 7, kind: input, shape index: {}]   ;;  %s864_s4 = inlined_call_operand.vmem [shape: f32[1,128], index: 4, kind: input, shape index: {}]   ;;  %s865_s6 = inlined_call_operand.vmem [shape: f32[1,64], index: 6, kind: input, shape index: {}]   ;;  %s866_s8 = inlined_call_operand.vmem [shape: f32[1,3], index: 8, kind: input, shape index: {}]   ;;  %s867_s9 = inlined_call_operand.vmem [shape: f32[8,3], index: 9, kind: output, shape index: {}]  }
   0x1   :  { %556 = vmatprep.subr.bf16.mxu0 %v625_v0  ;;  %v33_v1 = vld [vmem:[%s858_s1] sm:$0xff]  ;;  %v34_v2 = vld [vmem:[%s858_s1 + $0x8] sm:$0xff]  ;;  %v35_v3 = vld [vmem:[%s858_s1 + $0x10] sm:$0xff]  ;;  %464 = vmatprep.mubr.msk.f32.mxu0 %vm626_vm0, %v627_v4  ;;  %vm322_vm2 = vcmask 523264   ;;  %vm396_vm3 = vcmask 23552  }
   0x2   :  { %v557_v5 = vpack.c.bf16 %v34_v2, %v33_v1  ;;  %v36_v6 = vld [vmem:[%s858_s1 + $0x18] sm:$0xff]  ;;  %562 = vmatprep.subr.bf16.mxu1 %v625_v0  ;;  %v119_v7 = vld [vmem:[%s859_s3] sm:$0xff]  ;;  %499 = vmatprep.mubr.msk.f32.mxu1 %vm626_vm0, %v627_v4  ;;  %v120_v8 = vld [vmem:[%s859_s3 + $0x8] sm:$0xff] }
   0x3   :  { %v121_v9 = vld [vmem:[%s859_s3 + $0x10] sm:$0xff]  ;;  %v122_v10 = vld [vmem:[%s859_s3 + $0x18] sm:$0xff]  ;;  %v560_v11 = vpack.c.bf16 %v36_v6, %v35_v3  ;;  %v563_v12 = vpack.c.bf16 %v120_v8, %v119_v7  ;;  %v123_v14 = vld [vmem:[%s859_s3 + $0x20] sm:$0xff] }
   0x4   :  { %558 = vmatpush3.bf16.msra.mxu0 %v557_v5  ;;  %v566_v13 = vpack.c.bf16 %v122_v10, %v121_v9  ;;  %v124_v15 = vld [vmem:[%s859_s3 + $0x28] sm:$0xff]  ;;  %v32_v16 = vld [vmem:[%s860_s0] sm:$0xff]  ;;  %v125_v18 = vld [vmem:[%s859_s3 + $0x30] sm:$0xff] }
   0x5   :  { %559 = vmatprep.subr.bf16.mxu0 %v625_v0  ;;  %564 = vmatpush3.bf16.msra.mxu1 %v563_v12  ;;  %v569_v17 = vpack.c.bf16 %v124_v15, %v123_v14  ;;  %v126_v19 = vld [vmem:[%s859_s3 + $0x38] sm:$0xff]  ;;  %v127_v21 = vld [vmem:[%s859_s3 + $0x40] sm:$0xff]  ;;  %v128_v22 = vld [vmem:[%s859_s3 + $0x48] sm:$0xff] }
   0x6   :  { %565 = vmatprep.subr.bf16.mxu1 %v625_v0  ;;  %v572_v20 = vpack.c.bf16 %v126_v19, %v125_v18  ;;  %v575_v23 = vpack.c.bf16 %v128_v22, %v127_v21  ;;  %v129_v24 = vld [vmem:[%s859_s3 + $0x50] sm:$0xff]  ;;  %v130_v25 = vld [vmem:[%s859_s3 + $0x58] sm:$0xff]  ;;  %v131_v27 = vld [vmem:[%s859_s3 + $0x60] sm:$0xff] }
   0x7   :  { %v578_v26 = vpack.c.bf16 %v130_v25, %v129_v24  ;;  %v132_v28 = vld [vmem:[%s859_s3 + $0x68] sm:$0xff]  ;;  %v133_v30 = vld [vmem:[%s859_s3 + $0x70] sm:$0xff]  ;;  %v134_v31 = vld [vmem:[%s859_s3 + $0x78] sm:$0xff] }
   0x8   :  { %561 = vmatpush3.bf16.msra.mxu0 %v560_v11  ;;  %v581_v29 = vpack.c.bf16 %v132_v28, %v131_v27  ;;  %v584_v32 = vpack.c.bf16 %v134_v31, %v133_v30  ;;  %v213_v33 = vld [vmem:[%s861_s5] sm:$0xff]  ;;  %v214_v34 = vld [vmem:[%s861_s5 + $0x8] sm:$0xff]  ;;  %v215_v35 = vld [vmem:[%s861_s5 + $0x10] sm:$0xff] }
   0x9   :  { %586 = vmatprep.subr.bf16.mxu0 %v625_v0  ;;  %567 = vmatpush3.bf16.msra.mxu1 %v566_v13  ;;  %v587_v36 = vpack.c.bf16 %v214_v34, %v213_v33  ;;  %v216_v37 = vld [vmem:[%s861_s5 + $0x18] sm:$0xff]  ;;  %v217_v39 = vld [vmem:[%s861_s5 + $0x20] sm:$0xff]  ;;  %v218_v40 = vld [vmem:[%s861_s5 + $0x28] sm:$0xff] }
   0xa   :  { %568 = vmatprep.subr.bf16.mxu1 %v625_v0  ;;  %v590_v38 = vpack.c.bf16 %v216_v37, %v215_v35  ;;  %v593_v41 = vpack.c.bf16 %v218_v40, %v217_v39  ;;  %v219_v42 = vld [vmem:[%s861_s5 + $0x30] sm:$0xff]  ;;  %v220_v43 = vld [vmem:[%s861_s5 + $0x38] sm:$0xff]  ;;  %v221_v45 = vld [vmem:[%s861_s5 + $0x40] sm:$0xff] }
   0xb   :  { %465 = vmatmul.mubr.msk.f32.vlgmr.msra.gmra.mrb[0].mxu0 %vm44_vm1, %v32_v16  ;;  %v596_v44 = vpack.c.bf16 %v220_v43, %v219_v42  ;;  %v222_v46 = vld [vmem:[%s861_s5 + $0x48] sm:$0xff]  ;;  %v223_v48 = vld [vmem:[%s861_s5 + $0x50] sm:$0xff]  ;;  %v224_v49 = vld [vmem:[%s861_s5 + $0x58] sm:$0xff] }
   0xc   :  { %534 = vmatprep.mubr.msk.f32.mxu0 %vm626_vm0, %v627_v4  ;;  %588 = vmatpush3.bf16.msra.mxu0 %v587_v36  ;;  %v599_v47 = vpack.c.bf16 %v222_v46, %v221_v45  ;;  %v602_v50 = vpack.c.bf16 %v224_v49, %v223_v48  ;;  %v225_v51 = vld [vmem:[%s861_s5 + $0x60] sm:$0xff]  ;;  %v226_v52 = vld [vmem:[%s861_s5 + $0x68] sm:$0xff]  ;;  %v227_v59 = vld [vmem:[%s861_s5 + $0x70] sm:$0xff] }
   0xd   :  { %570 = vmatpush3.bf16.msra.mxu1 %v569_v17  ;;  %589 = vmatprep.subr.bf16.mxu0 %v625_v0  ;;  %v605_v53 = vpack.c.bf16 %v226_v52, %v225_v51  ;;  %v402_v54 = vld [vmem:[%s862_s2] ss:$0 sm:$0xff]  ;;  %v228_v60 = vld [vmem:[%s861_s5 + $0x78] sm:$0xff]  ;;  %v308_v63 = vld [vmem:[%s863_s7 + $0x8] sm:$0xff] }
   0xe   :  { %571 = vmatprep.subr.bf16.mxu1 %v625_v0  ;;  %v608_v61 = vpack.c.bf16 %v228_v60, %v227_v59  ;;  %v307_v62 = vld [vmem:[%s863_s7] sm:$0xff]  ;;  %v309_v1 = vld [vmem:[%s863_s7 + $0x10] sm:$0xff]  ;;  %v310_v3 = vld [vmem:[%s863_s7 + $0x18] sm:$0xff] }
   0xf   :  { %v611_v2 = vpack.c.bf16 %v308_v63, %v307_v62  ;;  %v311_v5 = vld [vmem:[%s863_s7 + $0x20] sm:$0xff]  ;;  %v312_v6 = vld [vmem:[%s863_s7 + $0x28] sm:$0xff]  ;;  %v313_v13 = vld [vmem:[%s863_s7 + $0x30] sm:$0xff] }
  0x10   :  { %591 = vmatpush3.bf16.msra.mxu0 %v590_v38  ;;  %v617_v7 = vpack.c.bf16 %v312_v6, %v311_v5  ;;  %v404_v8 = vld [vmem:[%s864_s4] ss:$0 sm:$0xff]  ;;  %v314_v14 = vld [vmem:[%s863_s7 + $0x38] sm:$0xff] }
  0x11   :  { %573 = vmatpush3.bf16.msra.mxu1 %v572_v20  ;;  %592 = vmatprep.subr.bf16.mxu0 %v625_v0  ;;  %v620_v15 = vpack.c.bf16 %v314_v14, %v313_v13  ;;  %v406_v20 = vld [vmem:[%s866_s8] ss:$0 sm:$0xff] }
  0x12   :  { %574 = vmatprep.subr.bf16.mxu1 %v625_v0 }
  0x14   :  { %594 = vmatpush3.bf16.msra.mxu0 %v593_v41 }
  0x15   :  { %576 = vmatpush3.bf16.msra.mxu1 %v575_v23  ;;  %595 = vmatprep.subr.bf16.mxu0 %v625_v0 }
  0x16   :  { %577 = vmatprep.subr.bf16.mxu1 %v625_v0 }
  0x18   :  { %597 = vmatpush3.bf16.msra.mxu0 %v596_v44 }
  0x19   :  { %579 = vmatpush3.bf16.msra.mxu1 %v578_v26  ;;  %598 = vmatprep.subr.bf16.mxu0 %v625_v0 }
  0x1a   :  { %580 = vmatprep.subr.bf16.mxu1 %v625_v0 }
  0x1c   :  { %600 = vmatpush3.bf16.msra.mxu0 %v599_v47 }
  0x1d   :  { %582 = vmatpush3.bf16.msra.mxu1 %v581_v29  ;;  %601 = vmatprep.subr.bf16.mxu0 %v625_v0 }
  0x1e   :  { %583 = vmatprep.subr.bf16.mxu1 %v625_v0 }
  0x20   :  { %603 = vmatpush3.bf16.msra.mxu0 %v602_v50 }
  0x21   :  { %585 = vmatpush3.bf16.msra.mxu1 %v584_v32  ;;  %604 = vmatprep.subr.bf16.mxu0 %v625_v0 }
  0x22   :  { %610 = vmatprep.subr.bf16.mxu1 %v625_v0 }
  0x24   :  { %606 = vmatpush3.bf16.msra.mxu0 %v605_v53 }
  0x25   :  { %607 = vmatprep.subr.bf16.mxu0 %v625_v0 }
  0x28   :  { %609 = vmatpush3.bf16.msra.mxu0 %v608_v61 }
  0xde   :  { %v114_v55 = vpop.f32.mrb[0].mxu0 }
  0xdf   :  { %v115_v56 = vadd.f32 %v402_v54, %v114_v55  ;;  %v466_v57 = vpop.f32.mrb[1].mxu0 }
  0xe1   :  { %v118_v58 = vmax.f32 %v115_v56, 0.0 }
  0xe3   :  { %500 = vmatmul.mubr.f32.vlgmr.msra.gmra.mrb[0].mxu1 %v118_v58 }
  0xe4   :  { %553 = vmatprep.mubr.msk.f32.mxu1 %vm626_vm0, %v627_v4  ;;  %612 = vmatpush3.bf16.msra.mxu1 %v611_v2  ;;  %v614_v4 = vpack.c.bf16 %v310_v3, %v309_v1 }
  0xe5   :  { %613 = vmatprep.subr.bf16.mxu1 %v625_v0 }
  0xe8   :  { %615 = vmatpush3.bf16.msra.mxu1 %v614_v4 }
  0xe9   :  { %616 = vmatprep.subr.bf16.mxu1 %v625_v0 }
  0xec   :  { %618 = vmatpush3.bf16.msra.mxu1 %v617_v7 }
  0xed   :  { %619 = vmatprep.subr.bf16.mxu1 %v625_v0  ;;  %v405_v0 = vld [vmem:[%s865_s6] ss:$0 sm:$0xff] }
  0xf0   :  { %621 = vmatpush3.bf16.msra.mxu1 %v620_v15 }
 0x1b6   :  { %v208_v9 = vpop.f32.mrb[0].mxu1 }
 0x1b7   :  { %v209_v10 = vadd.f32 %v404_v8, %v208_v9  ;;  %v501_v11 = vpop.f32.mrb[1].mxu1 }
 0x1b9   :  { %v212_v12 = vmax.f32 %v209_v10, 0.0 }
 0x1bb   :  { %535 = vmatmul.mubr.f32.vlgmr.msra.gmra.mrb[2].mxu0 %v212_v12 }
 0x28e   :  { %v302_v16 = vpop.f32.mrb[2].mxu0 }
 0x28f   :  { %v303_v17 = vadd.f32 %v405_v0, %v302_v16  ;;  %v536_v18 = vpop.f32.mrb[3].mxu0 }
 0x291   :  { %v306_v19 = vmax.f32 %v303_v17, 0.0 }
 0x293   :  { %554 = vmatmul.mubr.msk.f32.vlgmr.msra.gmra.mrb[2].mxu1 %vm322_vm2, %v306_v19 }
 0x366   :  { %v392_v21 = vpop.f32.mrb[2].mxu1 }
 0x367   :  { %v393_v22 = vadd.f32 %v406_v20, %v392_v21  ;;  %v555_v23 = vpop.f32.mrb[3].mxu1 }
 0x369   :  { %397 = vst.msk [vmem:[%s867_s9] sm:$0xff] %vm396_vm3, %v393_v22 }

</bundles_post_ra>
